<compile_context>
chip_gen: v5e
topology: v5e:2x2
jax: 0.10.0
libtpu: 0.0.40
codegen_flags: <defaults>
</compile_context>

<pallas_src>
import functools

import numpy as np
import jax
import jax.numpy as jnp
from jax.experimental import pallas as pl
from jax.experimental.pallas import tpu as pltpu


_CE_TILE_MAX = 4096          # tile upper bound for the two CE kernels
_MASK_TILE_MAX = 4096        # point-tile upper bound (v7x 64MiB-VMEM safe; v5e/v6e could take 8192)
_TILE_VMEM_BUDGET = 16 * 1024 * 1024   # byte budget for the double-buffered input blocks
_VMEM_LIMIT = 32 * 1024 * 1024


def _pick_tile(total, bytes_per_unit, max_tile, budget=_TILE_VMEM_BUDGET):
    """Tile extent along the grid-split axis: the full axis when it fits,
    otherwise the largest multiple of 128 keeping double-buffered blocks
    under `budget` bytes (and <= max_tile)."""
    cap = (budget // max(int(bytes_per_unit), 1)) // 128 * 128
    cap = int(max(128, min(max_tile, cap)))
    return int(total) if int(total) <= cap else cap


# ----------------------------------------------------------------------------
# Pallas kernels (tiled reductions; VMEM accumulators, single SMEM finalize)
# ----------------------------------------------------------------------------
def _weighted_ce_kernel(logits_ref, tgt_ref, w_ref, out_ref, acc_wnll, acc_w,
                        *, total_rows):
    """Weighted softmax CE, batched over layers, native (L, N, K) layout.

    logits_ref: (T, K) block of (L, N, K)  -- queries on sublanes, classes on lanes
    tgt_ref:    (T, 1) int32 block of (L, N, 1)
    w_ref:      (1, K) class weights (resident)
    out_ref:    (L, 2) f32 SMEM, row l = [sum_i w[t_i]*nll_i, sum_i w[t_i]]
    acc_*:      (T, 1) f32 VMEM running sums (per-step VPU adds only)
    """
    l = pl.program_id(0)
    p = pl.program_id(1)

    @pl.when(p == 0)
    def _init():
        acc_wnll[...] = jnp.zeros_like(acc_wnll)
        acc_w[...] = jnp.zeros_like(acc_w)

    x = logits_ref[...].astype(jnp.float32)                 # (T, K)
    tgt = tgt_ref[...]                                      # (T, 1)
    w = w_ref[...].astype(jnp.float32)                      # (1, K)
    t, k = x.shape

    row = jax.lax.broadcasted_iota(jnp.int32, (t, 1), 0) + p * t
    row_valid = row < total_rows                            # (T, 1)

    cls = jax.lax.broadcasted_iota(jnp.int32, (t, k), 1)
    onehot = (cls == tgt).astype(jnp.float32)               # (T, K)

    m = jnp.max(x, axis=1, keepdims=True)                                   # (T,1)
    lse = jnp.log(jnp.sum(jnp.exp(x - m), axis=1, keepdims=True)) + m       # (T,1)
    nll = lse - jnp.sum(onehot * x, axis=1, keepdims=True)                  # (T,1)
    w_i = jnp.sum(onehot * w, axis=1, keepdims=True)                        # (T,1)

    # Select (not multiply) so garbage in padded sublanes never propagates.
    acc_wnll[...] += jnp.where(row_valid, w_i * nll, 0.0)
    acc_w[...] += jnp.where(row_valid, w_i, 0.0)

    @pl.when(p == pl.num_programs(1) - 1)
    def _finalize():
        out_ref[l, 0] = jnp.sum(acc_wnll[...])
        out_ref[l, 1] = jnp.sum(acc_w[...])


def _ignore_ce_kernel(logits_ref, tgt_ref, out_ref, acc_nll, acc_cnt,
                      *, total_cols, ignore_index=255):
    """Softmax CE with ignore_index, consumed straight from NCHW (no transpose).

    logits_ref: (C, T) block of (B, C, H*W)   -- classes on sublanes, pixels on lanes
    tgt_ref:    (1, T) int32 block of (B, 1, H*W)
    out_ref:    (1, 2) f32 SMEM = [sum nll_valid, n_valid]   (whole batch)
    acc_*:      (1, T) f32 VMEM per-lane running sums
    """
    b = pl.program_id(0)
    p = pl.program_id(1)

    @pl.when(jnp.logical_and(b == 0, p == 0))
    def _init():
        acc_nll[...] = jnp.zeros_like(acc_nll)
        acc_cnt[...] = jnp.zeros_like(acc_cnt)

    x = logits_ref[...].astype(jnp.float32)                 # (C, T)
    tgt = tgt_ref[...]                                      # (1, T)
    c, t = x.shape

    col = jax.lax.broadcasted_iota(jnp.int32, (1, t), 1) + p * t
    valid = jnp.logical_and(col < total_cols, tgt != ignore_index)     # (1, T)

    cls = jax.lax.broadcasted_iota(jnp.int32, (c, t), 0)
    onehot = (cls == tgt).astype(jnp.float32)

    m = jnp.max(x, axis=0, keepdims=True)
    lse = jnp.log(jnp.sum(jnp.exp(x - m), axis=0, keepdims=True)) + m
    nll = lse - jnp.sum(onehot * x, axis=0, keepdims=True)             # (1, T)

    acc_nll[...] += jnp.where(valid, nll, 0.0)
    acc_cnt[...] += valid.astype(jnp.float32)

    @pl.when(jnp.logical_and(b == pl.num_programs(0) - 1,
                             p == pl.num_programs(1) - 1))
    def _finalize():
        out_ref[0, 0] = jnp.sum(acc_nll[...])
        out_ref[0, 1] = jnp.sum(acc_cnt[...])


def _mask_loss_kernel(logit_ref, label_ref, out_ref,
                      acc_py, acc_p, acc_y, acc_bce,
                      *, total_points, needs_mask):
    """Sigmoid BCE (mean over points, summed over masks) + dice (summed),
    batched over layers.

    logit_ref/label_ref: (R, T) blocks of (L, R, P)   (points on lanes)
    out_ref: (L, 2) f32 SMEM, row l = [sum_r mean_p bce, sum_r dice]
    acc_*:   (R, 1) f32 VMEM running sums
    """
    l = pl.program_id(0)
    s = pl.program_id(1)

    @pl.when(s == 0)
    def _init():
        acc_py[...] = jnp.zeros_like(acc_py)
        acc_p[...] = jnp.zeros_like(acc_p)
        acc_y[...] = jnp.zeros_like(acc_y)
        acc_bce[...] = jnp.zeros_like(acc_bce)

    x = logit_ref[...].astype(jnp.float32)                  # (R, T)
    y = label_ref[...].astype(jnp.float32)
    r, t = x.shape

    if needs_mask:
        # Only needed when P % tile != 0; padded lanes get x=-1e4 (sigmoid->0,
        # bce->0) and y=0 so every downstream term is exactly zero there.
        col = jax.lax.broadcasted_iota(jnp.int32, (1, t), 1) + s * t
        valid = col < total_points
        x = jnp.where(valid, x, -1e4)
        y = jnp.where(valid, y, 0.0)

    # One exp feeds both the softplus term and the sigmoid (EUP pressure /2).
    e = jnp.exp(-jnp.abs(x))
    softplus = jnp.log1p(e)                                 # BCEWithLogits parity
    bce = jnp.maximum(x, 0.0) - x * y + softplus
    r_inv = pl.reciprocal(1.0 + e, approx=True)             # sigmoid only (approx)
    prob = jnp.where(x >= 0.0, r_inv, e * r_inv)

    acc_bce[...] += jnp.sum(bce, axis=-1, keepdims=True)
    acc_py[...] += jnp.sum(prob * y, axis=-1, keepdims=True)
    acc_p[...] += jnp.sum(prob, axis=-1, keepdims=True)
    acc_y[...] += jnp.sum(y, axis=-1, keepdims=True)

    @pl.when(s == pl.num_programs(1) - 1)
    def _finalize():
        numer = 2.0 * acc_py[...] + 1.0
        denom = acc_p[...] + acc_y[...] + 1.0
        dice = 1.0 - numer / denom                          # exact divide once
        out_ref[l, 0] = jnp.sum(acc_bce[...]) * (1.0 / float(total_points))
        out_ref[l, 1] = jnp.sum(dice)


# ----------------------------------------------------------------------------
# Loss wrappers (pallas_call plumbing; no dtype casts of the big inputs here)
# ----------------------------------------------------------------------------
def weighted_cross_entropy_batched(logits_lnk, targets_ln1, weight_1k):
    """logits_lnk: (L, N, K) native layout; targets_ln1: (L, N, 1) int32;
    weight_1k: (1, K).  Returns per-layer weighted CE, shape (L,)."""
    L, N, K = logits_lnk.shape
    bytes_per_row = (K * 4 + 4) * 2           # logits row + target, double-buffered
    tile = _pick_tile(N, bytes_per_row, _CE_TILE_MAX)
    out = pl.pallas_call(
        functools.partial(_weighted_ce_kernel, total_rows=N),
        out_shape=jax.ShapeDtypeStruct((L, 2), jnp.float32),
        grid=(L, pl.cdiv(N, tile)),
        in_specs=[
            pl.BlockSpec((None, tile, K), lambda l, p: (l, p, 0)),
            pl.BlockSpec((None, tile, 1), lambda l, p: (l, p, 0)),
            pl.BlockSpec((1, K), lambda l, p: (0, 0)),
        ],
        out_specs=pl.BlockSpec(memory_space=pltpu.MemorySpace.SMEM),
        scratch_shapes=[pltpu.VMEM((tile, 1), jnp.float32),
                        pltpu.VMEM((tile, 1), jnp.float32)],
        compiler_params=pltpu.CompilerParams(
            dimension_semantics=("arbitrary", "arbitrary"),
            vmem_limit_bytes=_VMEM_LIMIT),
    )(logits_lnk, targets_ln1.astype(jnp.int32), weight_1k)
    # TODO(synk): for v7x megacore, block the (L,2) output per layer and mark
    # the leading axis "parallel".
    return jnp.where(out[:, 1] > 0,
                     out[:, 0] / jnp.maximum(out[:, 1], 1e-12), 0.0)


def cross_entropy_ignore255(logits_bchw, targets_bhw):
    """NCHW semantic logits + (B, H, W) int targets; ignore_index=255."""
    b, c, h, w = logits_bchw.shape
    hw = h * w
    logits = logits_bchw.reshape(b, c, hw)                  # free reshape, no transpose
    targets = targets_bhw.reshape(b, 1, hw).astype(jnp.int32)
    bytes_per_col = (c * 4 + 4) * 2
    tile = _pick_tile(hw, bytes_per_col, _CE_TILE_MAX)
    out = pl.pallas_call(
        functools.partial(_ignore_ce_kernel, total_cols=hw),
        out_shape=jax.ShapeDtypeStruct((1, 2), jnp.float32),
        grid=(b, pl.cdiv(hw, tile)),
        in_specs=[
            # TODO(synk): try pipeline_mode=pl.Buffered(3) on the logits spec if
            # xprof shows exposed DMA after the larger tiles.
            pl.BlockSpec((None, c, tile), lambda i, p: (i, 0, p)),
            pl.BlockSpec((None, 1, tile), lambda i, p: (i, 0, p)),
        ],
        out_specs=pl.BlockSpec(memory_space=pltpu.MemorySpace.SMEM),
        scratch_shapes=[pltpu.VMEM((1, tile), jnp.float32),
                        pltpu.VMEM((1, tile), jnp.float32)],
        compiler_params=pltpu.CompilerParams(
            dimension_semantics=("arbitrary", "arbitrary"),
            vmem_limit_bytes=_VMEM_LIMIT),
    )(logits, targets)
    return jnp.where(out[0, 1] > 0,
                     out[0, 0] / jnp.maximum(out[0, 1], 1.0), 0.0)


def mask_point_losses_batched(point_logits, point_labels, num_masks):
    """point_logits/labels: (L, R, P).  Returns (loss_mask, loss_dice), each (L,)."""
    L, r, p_num = point_logits.shape
    bytes_per_col = r * 4 * 2 * 2             # 2 inputs, double-buffered, f32 bound
    tile = _pick_tile(p_num, bytes_per_col, _MASK_TILE_MAX)
    needs_mask = (p_num % tile) != 0
    out = pl.pallas_call(
        functools.partial(_mask_loss_kernel, total_points=p_num,
                          needs_mask=needs_mask),
        out_shape=jax.ShapeDtypeStruct((L, 2), jnp.float32),
        grid=(L, pl.cdiv(p_num, tile)),
        in_specs=[
            pl.BlockSpec((None, r, tile), lambda l, s: (l, 0, s)),
            pl.BlockSpec((None, r, tile), lambda l, s: (l, 0, s)),
        ],
        out_specs=pl.BlockSpec(memory_space=pltpu.MemorySpace.SMEM),
        scratch_shapes=[pltpu.VMEM((r, 1), jnp.float32) for _ in range(4)],
        compiler_params=pltpu.CompilerParams(
            dimension_semantics=("arbitrary", "arbitrary"),
            vmem_limit_bytes=_VMEM_LIMIT),
    )(point_logits, point_labels)
    return out[:, 0] / num_masks, out[:, 1] / num_masks


# ----------------------------------------------------------------------------
# point_sample (bilinear grid_sample, align_corners=False) + point selection
# ----------------------------------------------------------------------------
def point_sample(inp, coords):
    """inp: (R, C, H, W); coords: (R, P, 2) in [0,1], last dim (x, y).
    4-corner bilinear gather with zero padding (grid_sample parity)."""
    r, c, h, w = inp.shape
    x = coords[..., 0] * w - 0.5
    y = coords[..., 1] * h - 0.5
    x0 = jnp.floor(x)
    y0 = jnp.floor(y)
    x1 = x0 + 1.0
    y1 = y0 + 1.0
    wx1 = x - x0
    wx0 = 1.0 - wx1
    wy1 = y - y0
    wy0 = 1.0 - wy1
    flat = inp.reshape(r, c, h * w)
    corners = ((x0, y0, wx0 * wy0), (x1, y0, wx1 * wy0),
               (x0, y1, wx0 * wy1), (x1, y1, wx1 * wy1))

    # TODO(synk): fuse this gather into the mask-loss Pallas kernel
    # (scalar-prefetch corner indices/weights, DMA the mask rows) for very
    # large H*W; the XLA gather is the remaining non-Pallas hot spot.
    def gather(ix, iy):
        valid = ((ix >= 0) & (ix <= w - 1) & (iy >= 0) & (iy <= h - 1))
        idx = (jnp.clip(iy, 0, h - 1).astype(jnp.int32) * w
               + jnp.clip(ix, 0, w - 1).astype(jnp.int32))           # (R, P)
        vals = jnp.take_along_axis(flat, idx[:, None, :], axis=2)    # (R, C, P)
        return vals * valid[:, None, :].astype(inp.dtype)

    out = None
    for ix, iy, wgt in corners:
        term = gather(ix, iy) * wgt[:, None, :].astype(inp.dtype)
        out = term if out is None else out + term
    return out


def get_uncertain_point_coords_with_randomness(key, coarse_logits, num_points,
                                               oversample_ratio,
                                               importance_sample_ratio):
    num_boxes = coarse_logits.shape[0]
    num_sampled = int(num_points * oversample_ratio)
    k1, k2 = jax.random.split(key)
    point_coords = jax.random.uniform(k1, (num_boxes, num_sampled, 2),
                                      dtype=jnp.float32)
    point_logits = point_sample(coarse_logits, point_coords)          # (R, 1, S)
    point_uncertainties = -jnp.abs(point_logits)                      # calculate_uncertainty
    num_uncertain = int(importance_sample_ratio * num_points)
    num_random = num_points - num_uncertain
    unc = point_uncertainties[:, 0, :].astype(jnp.float32)
    if num_sampled >= 128:
        # TPU-native approximate top-k (full sort avoided); selection tolerates it.
        _, idx = jax.lax.approx_max_k(unc, num_uncertain)
    else:
        _, idx = jax.lax.top_k(unc, num_uncertain)
    sel = jnp.take_along_axis(point_coords, idx[:, :, None], axis=1)
    if num_random > 0:
        rand = jax.random.uniform(k2, (num_boxes, num_random, 2),
                                  dtype=jnp.float32)
        sel = jnp.concatenate([sel, rand], axis=1)
    return sel


# ----------------------------------------------------------------------------
# Criterion (mirrors the PyTorch SeMaskSetCriterion forward semantics)
# ----------------------------------------------------------------------------
class SeMaskSetCriterion:
    def __init__(self, num_classes, matcher, weight_dict, eos_coef, losses,
                 num_points, oversample_ratio, importance_sample_ratio):
        self.num_classes = num_classes
        self.matcher = matcher
        self.weight_dict = weight_dict
        self.eos_coef = eos_coef
        self.losses = losses
        empty_weight = np.ones(num_classes + 1, np.float32)
        empty_weight[-1] = eos_coef
        self.empty_weight = jnp.asarray(empty_weight)
        self.num_points = num_points
        self.oversample_ratio = oversample_ratio
        self.importance_sample_ratio = importance_sample_ratio

    # --- permutation helpers (matching indices are host-side / static) ---
    @staticmethod
    def _get_src_permutation_idx(indices):
        batch_idx = np.concatenate(
            [np.full_like(np.asarray(src), i) for i, (src, _) in enumerate(indices)])
        src_idx = np.concatenate([np.asarray(src) for src, _ in indices])
        return batch_idx, src_idx

    @staticmethod
    def _get_tgt_permutation_idx(indices):
        batch_idx = np.concatenate(
            [np.full_like(np.asarray(tgt), i) for i, (_, tgt) in enumerate(indices)])
        tgt_idx = np.concatenate([np.asarray(tgt) for _, tgt in indices])
        return batch_idx, tgt_idx

    def _build_target_classes(self, targets, indices, b, q):
        tc = jnp.full((b, q), self.num_classes, jnp.int32)
        bidx, sidx = self._get_src_permutation_idx(indices)
        if len(sidx) == 0:
            return tc
        tco = np.concatenate([np.asarray(t['labels'])[np.asarray(J)]
                              for t, (_, J) in zip(targets, indices)]).astype(np.int32)
        return tc.at[jnp.asarray(bidx.astype(np.int32)),
                     jnp.asarray(sidx.astype(np.int32))].set(jnp.asarray(tco))

    # --- batched mask-loss helper (main + aux layers in ONE pallas_call) ---
    def _mask_losses_for_layers(self, layer_outputs, layer_indices, targets,
                                num_masks, key):
        # TODO(synk): ragged nested_tensor padding stays on host (per-image
        # mask counts/shapes differ); precompute once per batch in training.
        masks = [np.asarray(t['masks'], np.float32) for t in targets]
        max_n = max(m.shape[0] for m in masks)
        max_h = max(m.shape[1] for m in masks)
        max_w = max(m.shape[2] for m in masks)
        padded = np.zeros((len(masks), max_n, max_h, max_w), np.float32)
        for i, m in enumerate(masks):
            padded[i, :m.shape[0], :m.shape[1], :m.shape[2]] = m
        padded = jnp.asarray(padded)

        src_list, tgt_list = [], []
        for out_l, ind_l in zip(layer_outputs, layer_indices):
            src_b, src_q = self._get_src_permutation_idx(ind_l)
            tgt_b, tgt_m = self._get_tgt_permutation_idx(ind_l)
            src_list.append(out_l['pred_masks'][src_b, src_q])   # (R, Hp, Wp)
            tgt_list.append(padded[tgt_b, tgt_m])                # (R, Ht, Wt)
        assert all(s.shape[0] == src_list[0].shape[0] for s in src_list), \
            "matched-mask count must agree across layers"
        src_masks = jnp.stack(src_list, axis=0)                  # (L, R, Hp, Wp)
        target_masks = jnp.stack(tgt_list, axis=0)               # (L, R, Ht, Wt)
        L, R = src_masks.shape[0], src_masks.shape[1]

        src_flat = src_masks.reshape(L * R, 1, *src_masks.shape[2:])
        tgt_flat = target_masks.reshape(L * R, 1, *target_masks.shape[2:]
                                        ).astype(src_flat.dtype)

        # no_grad point selection (batched over all layers at once)
        point_coords = get_uncertain_point_coords_with_randomness(
            key, jax.lax.stop_gradient(src_flat), self.num_points,
            self.oversample_ratio, self.importance_sample_ratio)  # (L*R, P, 2)
        point_labels = jax.lax.stop_gradient(
            point_sample(tgt_flat, point_coords))[:, 0, :]        # (L*R, P)
        point_logits = point_sample(src_flat, point_coords)[:, 0, :]

        P = self.num_points
        return mask_point_losses_batched(
            point_logits.reshape(L, R, P), point_labels.reshape(L, R, P),
            num_masks)

    # --- individual losses (single-layer API kept for parity) ---
    def loss_labels(self, outputs, cls_outputs, targets, indices, num_masks):
        src_logits = outputs['pred_logits']                  # (B, Q, K)
        b, q, k = src_logits.shape
        tc = self._build_target_classes(targets, indices, b, q)
        loss_ce = weighted_cross_entropy_batched(
            src_logits.reshape(1, b * q, k), tc.reshape(1, b * q, 1),
            self.empty_weight.reshape(1, -1))[0]
        return {'loss_ce': loss_ce}

    def loss_cate(self, outputs, cls_outputs, targets, indices, num_masks):
        if cls_outputs is None:
            return {'loss_cate': jnp.zeros((), outputs['pred_logits'].dtype)}
        gt = jnp.stack([t['seg_maps'] for t in targets], axis=0)     # (B, H, W)
        return {'loss_cate': cross_entropy_ignore255(cls_outputs, gt)}

    def loss_masks(self, outputs, cls_outputs, targets, indices, num_masks,
                   rng=None):
        key = rng if rng is not None else jax.random.PRNGKey(1234)
        lm, ld = self._mask_losses_for_layers([outputs], [indices], targets,
                                              num_masks, key)
        return {'loss_mask': lm[0], 'loss_dice': ld[0]}

    def get_loss(self, loss, outputs, cls_outputs, targets, indices, num_masks):
        loss_map = {'labels': self.loss_labels,
                    'labels_cate': self.loss_cate,
                    'masks': self.loss_masks}
        assert loss in loss_map, f'do you really want to compute {loss} loss?'
        return loss_map[loss](outputs, cls_outputs, targets, indices, num_masks)

    def forward(self, outputs, cls_outputs, targets, rng=None):
        if rng is None:
            rng = jax.random.PRNGKey(1234)   # callers should pass a fresh key per step
        outputs_without_aux = {k: v for k, v in outputs.items()
                               if k != 'aux_outputs'}
        indices = self.matcher(outputs_without_aux, targets)
        aux_list = outputs.get('aux_outputs', [])
        aux_indices = [self.matcher(a, targets) for a in aux_list]

        num_masks = sum(len(t['labels']) for t in targets)
        # TODO(synk): torch.distributed all_reduce / world_size skipped (single host)
        num_masks = max(float(num_masks), 1.0)

        losses = {}
        for loss in self.losses:
            if loss == 'labels':
                # Main + all aux layers in ONE weighted-CE pallas_call, native
                # (L, B*Q, K) layout (no transpose).
                layer_logits = ([outputs['pred_logits']]
                                + [a['pred_logits'] for a in aux_list])
                layer_idx = [indices] + aux_indices
                b, q, k = layer_logits[0].shape
                nl = len(layer_logits)
                tc = jnp.stack([self._build_target_classes(targets, li, b, q)
                                for li in layer_idx], axis=0)            # (L,B,Q)
                logits_lnk = jnp.stack(layer_logits, axis=0).reshape(nl, b * q, k)
                ce = weighted_cross_entropy_batched(
                    logits_lnk, tc.reshape(nl, b * q, 1),
                    self.empty_weight.reshape(1, -1))                    # (L,)
                losses['loss_ce'] = ce[0]
                for i in range(len(aux_list)):
                    losses[f'loss_ce_{i}'] = ce[i + 1]
            elif loss == 'labels_cate':
                losses.update(self.loss_cate(outputs, cls_outputs['pred'],
                                             targets, indices, num_masks))
                for i, a in enumerate(aux_list):
                    l_dict = self.loss_cate(a, None, targets, aux_indices[i],
                                            num_masks)
                    losses[f'loss_cate_{i}'] = l_dict['loss_cate']
            elif loss == 'masks':
                # Main + all aux layers in ONE mask/dice pallas_call; the
                # point_sample / top-k prologue is batched across layers too.
                rng, sub = jax.random.split(rng)
                layer_outs = [outputs] + aux_list
                layer_idx = [indices] + aux_indices
                lm, ld = self._mask_losses_for_layers(layer_outs, layer_idx,
                                                      targets, num_masks, sub)
                losses['loss_mask'] = lm[0]
                losses['loss_dice'] = ld[0]
                for i in range(len(aux_list)):
                    losses[f'loss_mask_{i}'] = lm[i + 1]
                    losses[f'loss_dice_{i}'] = ld[i + 1]
            else:
                raise AssertionError(
                    f'do you really want to compute {loss} loss?')
        return losses


def identity_matcher(outputs, targets):
    # TODO(synk): Hungarian matcher has no clean Pallas equivalent; using a
    # deterministic identity assignment (query i <-> target i) instead.
    return [(np.arange(len(t['labels']), dtype=np.int64),
             np.arange(len(t['labels']), dtype=np.int64)) for t in targets]


# ----------------------------------------------------------------------------
if __name__ == "__main__":
    key = jax.random.PRNGKey(0)
    B, Q, num_classes = 2, 8, 3
    Hp, Wp = 16, 16            # predicted mask resolution
    Hs, Ws = 32, 32            # semantic / target mask resolution
    n_aux = 2
    ks = jax.random.split(key, 16)

    pred_logits = jax.random.normal(ks[0], (B, Q, num_classes + 1), jnp.float32)
    pred_masks = jax.random.normal(ks[1], (B, Q, Hp, Wp), jnp.float32)
    cls_pred = jax.random.normal(ks[2], (B, num_classes, Hs, Ws), jnp.float32)
    aux_outputs = [
        {'pred_logits': jax.random.normal(ks[3 + 2 * i],
                                          (B, Q, num_classes + 1), jnp.float32),
         'pred_masks': jax.random.normal(ks[4 + 2 * i],
                                         (B, Q, Hp, Wp), jnp.float32)}
        for i in range(n_aux)]

    seg_np = np.array(jax.random.randint(ks[8], (B, Hs, Ws), 0, num_classes),
                      np.int32)
    seg_np[:, :2, :] = 255     # some ignored pixels

    n_objs = [3, 2]
    targets = []
    for bi in range(B):
        lbl = np.array(jax.random.randint(ks[9 + bi], (n_objs[bi],), 0,
                                          num_classes), np.int32)
        msk = (np.array(jax.random.uniform(ks[11 + bi], (n_objs[bi], Hs, Ws)))
               > 0.5).astype(np.float32)
        targets.append({'labels': lbl,
                        'masks': msk,
                        'seg_maps': jnp.asarray(seg_np[bi])})

    outputs = {'pred_logits': pred_logits, 'pred_masks': pred_masks,
               'aux_outputs': aux_outputs}
    cls_outputs = {'pred': cls_pred}

    weight_dict = {'loss_ce': 1.0, 'loss_cate': 1.0,
                   'loss_mask': 20.0, 'loss_dice': 1.0}
    criterion = SeMaskSetCriterion(
        num_classes=num_classes, matcher=identity_matcher,
        weight_dict=weight_dict, eos_coef=0.1,
        losses=['labels', 'labels_cate', 'masks'],
        num_points=32, oversample_ratio=3.0, importance_sample_ratio=0.75)

    losses = criterion.forward(outputs, cls_outputs, targets,
                               rng=jax.random.PRNGKey(42))
    losses = {k: jax.block_until_ready(v) for k, v in losses.items()}
    for k, v in losses.items():
        assert np.all(np.isfinite(np.asarray(v))), k
    print("KERNEL_OK")
</pallas_src>

<mosaic_0001>
module attributes {stable_mosaic.version = 11 : i64} {
  func.func @_weighted_ce_kernel(%arg0: i32, %arg1: i32, %arg2: memref<1x16x4xf32, #tpu.memory_space<vmem>>, %arg3: memref<1x16x1xi32, #tpu.memory_space<vmem>>, %arg4: memref<1x4xf32, #tpu.memory_space<vmem>>, %arg5: memref<3x2xf32, #tpu.memory_space<smem>>, %arg6: memref<16x1xf32, #tpu.memory_space<vmem>>, %arg7: memref<16x1xf32, #tpu.memory_space<vmem>>) attributes {dimension_semantics = [#tpu.dimension_semantics<arbitrary>, #tpu.dimension_semantics<arbitrary>], iteration_bounds = array<i64: 3, 1>, scalar_prefetch = 0 : i64, scratch_operands = 2 : i64, tpu.core_type = #tpu.core_type<tc>, window_params = [{transform_indices = @transform_0, window_bounds = array<i64: 1, 16, 4>}, {transform_indices = @transform_1, window_bounds = array<i64: 1, 16, 1>}, {pipeline_mode = #tpu.pipeline_mode<synchronous>, transform_indices = @transform_2, window_bounds = array<i64: 1, 4>}, {transform_indices = @transform_3, window_bounds = array<i64: 3, 2>}]} {
    %c0_i32 = arith.constant 0 : i32
    %0 = arith.cmpi eq, %arg1, %c0_i32 : i32
    %1 = arith.extui %0 : i1 to i32
    %c0_i32_0 = arith.constant 0 : i32
    %2 = arith.cmpi ne, %1, %c0_i32_0 : i32
    scf.if %2 {
      %cst_24 = arith.constant 0.000000e+00 : f32
      %50 = vector.broadcast %cst_24 : f32 to vector<16x1xf32>
      %c0_25 = arith.constant 0 : index
      %c0_26 = arith.constant 0 : index
      %51 = vector.load %arg6[%c0_25, %c0_26] : memref<16x1xf32, #tpu.memory_space<vmem>>, vector<16x1xf32>
      tpu.vector_store %arg6[%c0_25, %c0_26], %50 {strides = array<i32>} : memref<16x1xf32, #tpu.memory_space<vmem>>, vector<16x1xf32>,
      %cst_27 = arith.constant 0.000000e+00 : f32
      %52 = vector.broadcast %cst_27 : f32 to vector<16x1xf32>
      %c0_28 = arith.constant 0 : index
      %c0_29 = arith.constant 0 : index
      %53 = vector.load %arg7[%c0_28, %c0_29] : memref<16x1xf32, #tpu.memory_space<vmem>>, vector<16x1xf32>
      tpu.vector_store %arg7[%c0_28, %c0_29], %52 {strides = array<i32>} : memref<16x1xf32, #tpu.memory_space<vmem>>, vector<16x1xf32>,
    } else {
    }
    %c0 = arith.constant 0 : index
    %c0_1 = arith.constant 0 : index
    %c0_2 = arith.constant 0 : index
    %3 = vector.load %arg2[%c0, %c0_1, %c0_2] : memref<1x16x4xf32, #tpu.memory_space<vmem>>, vector<1x16x4xf32>
    %4 = vector.shape_cast %3 : vector<1x16x4xf32> to vector<16x4xf32>
    %c0_3 = arith.constant 0 : index
    %c0_4 = arith.constant 0 : index
    %c0_5 = arith.constant 0 : index
    %5 = vector.load %arg3[%c0_3, %c0_4, %c0_5] : memref<1x16x1xi32, #tpu.memory_space<vmem>>, vector<1x16x1xi32>
    %6 = vector.shape_cast %5 : vector<1x16x1xi32> to vector<16x1xi32>
    %c0_6 = arith.constant 0 : index
    %c0_7 = arith.constant 0 : index
    %7 = vector.load %arg4[%c0_6, %c0_7] : memref<1x4xf32, #tpu.memory_space<vmem>>, vector<1x4xf32>
    %8 = tpu.iota {dimensions = array<i32: 0>} : vector<16x1xi32>
    %c16_i32 = arith.constant 16 : i32
    %9 = arith.muli %arg1, %c16_i32 : i32
    %10 = vector.broadcast %9 : i32 to vector<16x1xi32>
    %11 = arith.addi %8, %10 : vector<16x1xi32>
    %c16_i32_8 = arith.constant 16 : i32
    %12 = vector.broadcast %c16_i32_8 : i32 to vector<16x1xi32>
    %13 = arith.cmpi slt, %11, %12 : vector<16x1xi32>
    %14 = tpu.iota {dimensions = array<i32: 1>} : vector<16x4xi32>
    %15 = vector.broadcast %6 : vector<16x1xi32> to vector<16x4xi32>
    %16 = arith.cmpi eq, %14, %15 : vector<16x4xi32>
    %17 = arith.extui %16 : vector<16x4xi1> to vector<16x4xi32>
    %18 = arith.sitofp %17 : vector<16x4xi32> to vector<16x4xf32>
    %cst = arith.constant dense<0xFF800000> : vector<16xf32>
    %19 = vector.multi_reduction <maximumf>, %4, %cst [1] : vector<16x4xf32> to vector<16xf32>
    %20 = vector.shape_cast %19 : vector<16xf32> to vector<16x1xf32>
    %21 = vector.broadcast %20 : vector<16x1xf32> to vector<16x4xf32>
    %22 = arith.subf %4, %21 : vector<16x4xf32>
    %23 = math.exp %22 : vector<16x4xf32>
    %cst_9 = arith.constant dense<0.000000e+00> : vector<16xf32>
    %24 = vector.multi_reduction <add>, %23, %cst_9 [1] : vector<16x4xf32> to vector<16xf32>
    %25 = vector.shape_cast %24 : vector<16xf32> to vector<16x1xf32>
    %26 = math.log %25 : vector<16x1xf32>
    %27 = arith.addf %26, %20 : vector<16x1xf32>
    %28 = arith.mulf %18, %4 : vector<16x4xf32>
    %cst_10 = arith.constant dense<0.000000e+00> : vector<16xf32>
    %29 = vector.multi_reduction <add>, %28, %cst_10 [1] : vector<16x4xf32> to vector<16xf32>
    %30 = vector.shape_cast %29 : vector<16xf32> to vector<16x1xf32>
    %31 = arith.subf %27, %30 : vector<16x1xf32>
    %32 = vector.broadcast %7 : vector<1x4xf32> to vector<16x4xf32>
    %33 = arith.mulf %18, %32 : vector<16x4xf32>
    %cst_11 = arith.constant dense<0.000000e+00> : vector<16xf32>
    %34 = vector.multi_reduction <add>, %33, %cst_11 [1] : vector<16x4xf32> to vector<16xf32>
    %35 = vector.shape_cast %34 : vector<16xf32> to vector<16x1xf32>
    %c0_12 = arith.constant 0 : index
    %c0_13 = arith.constant 0 : index
    %36 = vector.load %arg6[%c0_12, %c0_13] : memref<16x1xf32, #tpu.memory_space<vmem>>, vector<16x1xf32>
    %37 = arith.mulf %35, %31 : vector<16x1xf32>
    %cst_14 = arith.constant 0.000000e+00 : f32
    %38 = vector.broadcast %cst_14 : f32 to vector<16x1xf32>
    %39 = arith.select %13, %37, %38 : vector<16x1xi1>, vector<16x1xf32>
    %40 = arith.addf %36, %39 : vector<16x1xf32>
    %c0_15 = arith.constant 0 : index
    %c0_16 = arith.constant 0 : index
    %41 = vector.load %arg6[%c0_15, %c0_16] : memref<16x1xf32, #tpu.memory_space<vmem>>, vector<16x1xf32>
    tpu.vector_store %arg6[%c0_15, %c0_16], %40 {strides = array<i32>} : memref<16x1xf32, #tpu.memory_space<vmem>>, vector<16x1xf32>,
    %c0_17 = arith.constant 0 : index
    %c0_18 = arith.constant 0 : index
    %42 = vector.load %arg7[%c0_17, %c0_18] : memref<16x1xf32, #tpu.memory_space<vmem>>, vector<16x1xf32>
    %cst_19 = arith.constant 0.000000e+00 : f32
    %43 = vector.broadcast %cst_19 : f32 to vector<16x1xf32>
    %44 = arith.select %13, %35, %43 : vector<16x1xi1>, vector<16x1xf32>
    %45 = arith.addf %42, %44 : vector<16x1xf32>
    %c0_20 = arith.constant 0 : index
    %c0_21 = arith.constant 0 : index
    %46 = vector.load %arg7[%c0_20, %c0_21] : memref<16x1xf32, #tpu.memory_space<vmem>>, vector<16x1xf32>
    tpu.vector_store %arg7[%c0_20, %c0_21], %45 {strides = array<i32>} : memref<16x1xf32, #tpu.memory_space<vmem>>, vector<16x1xf32>,
    %c0_i32_22 = arith.constant 0 : i32
    %47 = arith.cmpi eq, %arg1, %c0_i32_22 : i32
    %48 = arith.extui %47 : i1 to i32
    %c0_i32_23 = arith.constant 0 : i32
    %49 = arith.cmpi ne, %48, %c0_i32_23 : i32
    scf.if %49 {
      %c0_24 = arith.constant 0 : index
      %c0_25 = arith.constant 0 : index
      %50 = vector.load %arg6[%c0_24, %c0_25] : memref<16x1xf32, #tpu.memory_space<vmem>>, vector<16x1xf32>
      %51 = vector.shape_cast %50 : vector<16x1xf32> to vector<1x16x1xf32>
      %cst_26 = arith.constant dense<0.000000e+00> : vector<1xf32>
      %52 = vector.multi_reduction <add>, %51, %cst_26 [1, 2] : vector<1x16x1xf32> to vector<1xf32>
      %53 = vector.shape_cast %52 : vector<1xf32> to vector<1x1x1xf32>
      %54 = vector.extract %53[0, 0, 0] : f32 from vector<1x1x1xf32>
      %55 = arith.index_cast %arg0 : i32 to index
      %c0_27 = arith.constant 0 : index
      %56 = memref.load %arg5[%55, %c0_27] : memref<3x2xf32, #tpu.memory_space<smem>>
      memref.store %54, %arg5[%55, %c0_27] : memref<3x2xf32, #tpu.memory_space<smem>>
      %c0_28 = arith.constant 0 : index
      %c0_29 = arith.constant 0 : index
      %57 = vector.load %arg7[%c0_28, %c0_29] : memref<16x1xf32, #tpu.memory_space<vmem>>, vector<16x1xf32>
      %58 = vector.shape_cast %57 : vector<16x1xf32> to vector<1x16x1xf32>
      %cst_30 = arith.constant dense<0.000000e+00> : vector<1xf32>
      %59 = vector.multi_reduction <add>, %58, %cst_30 [1, 2] : vector<1x16x1xf32> to vector<1xf32>
      %60 = vector.shape_cast %59 : vector<1xf32> to vector<1x1x1xf32>
      %61 = vector.extract %60[0, 0, 0] : f32 from vector<1x1x1xf32>
      %62 = arith.index_cast %arg0 : i32 to index
      %c1 = arith.constant 1 : index
      %63 = memref.load %arg5[%62, %c1] : memref<3x2xf32, #tpu.memory_space<smem>>
      memref.store %61, %arg5[%62, %c1] : memref<3x2xf32, #tpu.memory_space<smem>>
    } else {
    }
    return
  }
  func.func @transform_0(%arg0: i32, %arg1: i32) -> (i32, i32, i32) {
    %c0_i32 = arith.constant 0 : i32
    %c0_i32_0 = arith.constant 0 : i32
    return %arg0, %arg1, %c0_i32 : i32, i32, i32
  }
  func.func @transform_1(%arg0: i32, %arg1: i32) -> (i32, i32, i32) {
    %c0_i32 = arith.constant 0 : i32
    %c0_i32_0 = arith.constant 0 : i32
    return %arg0, %arg1, %c0_i32 : i32, i32, i32
  }
  func.func @transform_2(%arg0: i32, %arg1: i32) -> (i32, i32) {
    %c0_i32 = arith.constant 0 : i32
    %c0_i32_0 = arith.constant 0 : i32
    %c0_i32_1 = arith.constant 0 : i32
    return %c0_i32, %c0_i32_0 : i32, i32
  }
  func.func @transform_3(%arg0: i32, %arg1: i32) -> (i32, i32) {
    %c0_i32 = arith.constant 0 : i32
    %c0_i32_0 = arith.constant 0 : i32
    %c0_i32_1 = arith.constant 0 : i32
    return %c0_i32, %c0_i32_0 : i32, i32
  }
}

</mosaic_0001>

<bundles_post_ra>
// kernel: tpu_custom_call.1
= control target key start
LH: loop header
LB: loop body
LE: loop exit
PB: predicated region body
PF: predicated region fallthrough
CT: control target
= control target key end

     0   :  { %8 = vsyncpa [#allocation5], 0  ;;  %s576_s12 = smov 0   ;;  %s578_s13 = smov 0   ;;  %s643_s0 = inlined_call_operand.vmem [shape: f32[3,16,4], index: 0, kind: input, shape index: {}]   ;;  %s644_s1 = inlined_call_operand.vmem [shape: s32[3,16,1], index: 1, kind: input, shape index: {}]   ;;  %s645_s2 = inlined_call_operand.vmem [shape: f32[1,4], index: 2, kind: input, shape index: {}]   ;;  %s646_s3 = inlined_call_operand.vmem [shape: f32[3,2], index: 3, kind: output, shape index: {}]  }
   0x1   :  { %s580_s14 = smov 0  }
   0x2 LB: > { %s445_s15 = sadd.s32 4294967295, %s551_s14   ;;  %s26_s16 = sadd.s32 1, %s547_s13  ;;  %s551_s14 = sphi %s580_s14, %s14_s14   ;;  %s547_s13 = sphi %s578_s13, %s648_s13   ;;  %s543_s12 = sphi %s576_s12, %s647_s12  }
   0x3   : > { %p28_p0 = scmp.ge.s32.totalorder %s26_s16, 3  ;;  %p448_p1 = scmp.ge.s32.totalorder %s551_s14, 1 }
   0x4   : > { %p169_p2 = scmp.lt.s32.totalorder %s551_s14, 4 }
   0x5   : > { %s650_s16 = smov (%p28_p0, %s26_s16), 0 }
   0x6   : > { %p170_p3 = pnand %p448_p1, %p169_p2 }
   0x7   : > { %p202_p4 = scmp.lt.s32.totalorder (!%p170_p3), %s543_s12, 2  ;;  %s455_s27 = sshll.u32 (!%p170_p3), %s543_s12, 7 }
   0x8   : > { %173 = sbr.rel (%p170_p3) target bundleno = 484 (0x1e4), region = 32  ;;  %s366_s30 = sshll.u32 (!%p170_p3), %s646_s3, 4  ;;  %s367_s30 = int_to_ptr.vmem [resolvable:$true] %s366_s30 }
   0x9   : > { %s341_s4 = scalar_lea.smem (!%p170_p3), [#allocation4], %s455_s27  ;;  %p471_p5 = scmp.eq.s32.totalorder (!%p170_p3), %s445_s15, 2 }
   0xa   : > { %s412_s5 = scalar_lea.smem (!%p170_p3), %s341_s4, 1 [#allocation4]  ;;  %s555_s8 = smov (!%p170_p3), [#allocation4]  }
   0xd   : > { %v553_v0 = vmov 0   ;;  %s203_s17 = scalar_select %p202_p4, %s543_s12, 2  ;;  %vm258_vm0 = vcmask 31744   ;;  %v244_v7 = vlaneseq  ;;  %v554_v11 = vmov 0.0   ;;  %v502_v17 = vld [vmem:[%s645_s2] ss:$0 sm:$0xff] }
   0xe   : > { %500 = vset.pattern.permute.xlu1 %v553_v0  ;;  %501 = vset.pattern.permute.xlu0 %v553_v0  ;;  %vm225_vm3 = vcmask 7168  }
   0xf   : > { %s461_s18 = sshll.u32 %s203_s17, 4  ;;  %v245_v8 = vand.u32 127, %v244_v7  ;;  %227 = vst.msk [vmem:[#allocation2 + $0x8] sm:$0xff] %vm225_vm3, %v554_v11 }
  0x10   : > { %s209_s21 = scalar_lea.vmem %s643_s0, %s461_s18  ;;  %s219_s24 = scalar_lea.vmem %s644_s1, %s461_s18  ;;  %229 = vst.msk [vmem:[#allocation3 + $0x8] sm:$0xff] %vm225_vm3, %v554_v11 }
  0x11   : > { %v230_v1 = vld [vmem:[%s209_s21] sm:$0xff]  ;;  %v231_v4 = vld [vmem:[%s209_s21 + $0x8] sm:$0xff]  ;;  %226 = vst.msk [vmem:[#allocation2] sm:$0xff] %vm225_vm3, %v554_v11 }
  0x12   : > { %v232_v2 = vld [vmem:[%s219_s24] sm:$0xff]  ;;  %v259_v3 = vsel %vm258_vm0, %v230_v1, -inf  ;;  %v233_v5 = vld [vmem:[%s219_s24 + $0x8] sm:$0xff]  ;;  %v262_v6 = vsel %vm258_vm0, %v231_v4, -inf  ;;  %228 = vst.msk [vmem:[#allocation3] sm:$0xff] %vm225_vm3, %v554_v11 }
  0x13   : > { %247 = vperm.xlu1 %500, %v232_v2   ;;  %260 = vmax.xlane.f32.xlu0 %v259_v3 }
  0x16   : > { %v305_v54 = vld [vmem:[#allocation2 + $0x8] sm:$0xff] }
  0x17   : > { %v316_v34 = vld [vmem:[#allocation3 + $0x8] sm:$0xff] }
  0x18   : > { %v304_v46 = vld [vmem:[#allocation2] sm:$0xff] }
  0x19   : > { %v315_v42 = vld [vmem:[#allocation3] sm:$0xff] }
  0x1b   : > { %250 = vperm.xlu1 %500, %v233_v5   ;;  %263 = vmax.xlane.f32.xlu0 %v262_v6 }
  0x85   : > { %v248_v9 = vpop.permute.xlu1 %247 }
  0x86   : > { %vm252_vm1 = vcmp.eq.s32.totalorder %v245_v8, %v248_v9  ;;  %v261_v10 = vpop.xlane.xlu0 %260 }
  0x87   : > { %v453_v12 = vsel %vm252_vm1, 1.0, %v554_v11  ;;  %v265_v13 = vsub.f32 %v230_v1, %v261_v10 }
  0x88   : > { %v283_v14 = vmul.f32 %v453_v12, %v230_v1  ;;  %v296_v31 = vmul.f32 %v502_v17, %v453_v12 }
  0x89   : > { %v267_v15 = vmul.f32 1.442695, %v265_v13 }
  0x8a   : > { %v285_v16 = vsel %vm258_vm0, %v283_v14, 0.0  ;;  %v298_v32 = vsel %vm258_vm0, %v296_v31, 0.0 }
  0x8b   : > { %286 = vadd.xlane.f32.xlu0 %v285_v16  ;;  %503 = vpow2.f32 %v267_v15 }
  0x8d   : > { %v251_v18 = vpop.permute.xlu1 %250 }
  0x8e   : > { %vm253_vm2 = vcmp.eq.s32.totalorder %v245_v8, %v251_v18  ;;  %v264_v19 = vpop.xlane.xlu0 %263 }
  0x8f   : > { %v454_v20 = vsel %vm253_vm2, 1.0, %v554_v11  ;;  %v266_v21 = vsub.f32 %v231_v4, %v264_v19 }
  0x90   : > { %v284_v22 = vmul.f32 %v454_v20, %v231_v4  ;;  %v297_v23 = vmul.f32 %v502_v17, %v454_v20 }
  0x91   : > { %v504_v24 = vpop.eup %503  ;;  %v269_v25 = vmul.f32 1.442695, %v266_v21 }
  0x92   : > { %v288_v26 = vsel %vm258_vm0, %v284_v22, 0.0  ;;  %v301_v27 = vsel %vm258_vm0, %v297_v23, 0.0  ;;  %v271_v28 = vsel %vm258_vm0, %v504_v24, 0.0 }
  0x93   : > { %289 = vadd.xlane.f32.xlu1 %v288_v26  ;;  %302 = vadd.xlane.f32.xlu0 %v301_v27  ;;  %505 = vpow2.f32 %v269_v25 }
  0x94   : > { %272 = vadd.xlane.f32.xlu2 %v271_v28 }
  0x99   : > { %v506_v29 = vpop.eup %505 }
  0x9a   : > { %v274_v30 = vsel %vm258_vm0, %v506_v29, 0.0 }
  0x9c   : > { %275 = vadd.xlane.f32.xlu2 %v274_v30 }
  0xa4   : > { %299 = vadd.xlane.f32.xlu2 %v298_v32 }
  0xfe   : > { %v287_v33 = vpop.xlane.xlu0 %286 }
 0x106   : > { %v303_v35 = vpop.xlane.xlu0 %302  ;;  %v290_v51 = vpop.xlane.xlu1 %289 }
 0x107   : > { %v273_v36 = vpop.xlane.xlu2 %272  ;;  %v320_v37 = vadd.f32 %v316_v34, %v303_v35 }
 0x108   : > { %507 = vlog2.f32 %v273_v36 }
 0x109   : > { %322 = vst.msk [vmem:[#allocation3 + $0x8] sm:$0xff] %vm225_vm3, %v320_v37 }
 0x10e   : > { %v508_v38 = vpop.eup %507 }
 0x10f   : > { %v278_v39 = vmul.f32 0.6931472, %v508_v38  ;;  %v276_v40 = vpop.xlane.xlu2 %275 }
 0x110   : > { %509 = vlog2.f32 %v276_v40  ;;  %v344_v57 = vld [vmem:[#allocation3 + $0x8] sm:$0xff] }
 0x111   : > { %v281_v41 = vadd.f32 %v278_v39, %v261_v10  ;;  %v346_v60 = vsel %vm225_vm3, %v344_v57, 0.0 }
 0x113   : > { %v291_v44 = vsub.f32 %v281_v41, %v287_v33 }
 0x116   : > { %v510_v43 = vpop.eup %509 }
 0x117   : > { %v280_v45 = vmul.f32 0.6931472, %v510_v43  ;;  %v300_v47 = vpop.xlane.xlu2 %299 }
 0x118   : > { %v306_v48 = vmul.f32 %v300_v47, %v291_v44  ;;  %v319_v49 = vadd.f32 %v315_v42, %v300_v47 }
 0x119   : > { %v282_v50 = vadd.f32 %v280_v45, %v264_v19 }
 0x11a   : > { %v310_v52 = vadd.f32 %v306_v48, %v304_v46  ;;  %321 = vst.msk [vmem:[#allocation3] sm:$0xff] %vm225_vm3, %v319_v49 }
 0x11b   : > { %v292_v53 = vsub.f32 %v282_v50, %v290_v51 }
 0x11c   : > { %313 = vst.msk [vmem:[#allocation2] sm:$0xff] %vm225_vm3, %v310_v52 }
 0x11d   : > { %v307_v55 = vmul.f32 %v303_v35, %v292_v53 }
 0x11f   : > { %v311_v56 = vadd.f32 %v307_v55, %v305_v54 }
 0x121   : > { %314 = vst.msk [vmem:[#allocation2 + $0x8] sm:$0xff] %vm225_vm3, %v311_v56  ;;  %v343_v58 = vld [vmem:[#allocation3] sm:$0xff] }
 0x122   : > { %v345_v59 = vsel %vm225_vm3, %v343_v58, 0.0 }
 0x123   : > { %v347_v61 = vadd.f32 %v346_v60, %v345_v59  ;;  %v326_v62 = vld [vmem:[#allocation2] sm:$0xff] }
 0x124   : > { %v328_v0 = vsel %vm225_vm3, %v326_v62, 0.0 }
 0x125   : > { %348 = vadd.xlane.f32.xlu0 %v347_v61 }
 0x128   : > { %v327_v63 = vld [vmem:[#allocation2 + $0x8] sm:$0xff] }
 0x129   : > { %v329_v1 = vsel %vm225_vm3, %v327_v63, 0.0 }
 0x12a   : > { %v330_v2 = vadd.f32 %v329_v1, %v328_v0 }
 0x12c   : > { %331 = vadd.xlane.f32.xlu2 %v330_v2 }
 0x198   : > { %v349_v3 = vpop.xlane.xlu0 %348 }
 0x199   : > { %v350_v4 = vrot.slane %v349_v3, 4 }
 0x19b   : > { %v351_v5 = vadd.f32 %v350_v4, %v349_v3 }
 0x19d   : > { %v352_v6 = vrot.slane %v351_v5, 2 }
 0x19f   : > { %v332_v7 = vpop.xlane.xlu2 %331  ;;  %v353_v10 = vadd.f32 %v352_v6, %v351_v5 }
 0x1a0   : > { %v333_v8 = vrot.slane %v332_v7, 4 }
 0x1a1   : > { %v354_v13 = vrot.slane %v353_v10, 1 }
 0x1a2   : > { %v334_v9 = vadd.f32 %v333_v8, %v332_v7 }
 0x1a3   : > { %v355_v16 = vadd.f32 %v354_v13, %v353_v10 }
 0x1a4   : > { %v335_v11 = vrot.slane %v334_v9, 2 }
 0x1a6   : > { %v336_v12 = vadd.f32 %v335_v11, %v334_v9 }
 0x1a8   : > { %v337_v14 = vrot.slane %v336_v12, 1 }
 0x1aa   : > { %v338_v15 = vadd.f32 %v337_v14, %v336_v12 }
 0x1ac   : > { %463 = vpush %v338_v15 }
 0x1ad   : > { %465 = vpush %v355_v16 }
 0x1dd   : > { %s464_s6 = spop %463 }
 0x1de   : > { %342 = sst [smem:[%s341_s4]] %s464_s6  ;;  %s466_s7 = spop %465 }
 0x1df   : > { %359 = sst [smem:[%s412_s5]] %s466_s7 }
 0x1e0   : > { %468 = dma.smem_to_vmem (%p471_p5), %s555_s8, 64, %s367_s30, [#allocation5]  }
 0x1e1   : > { %538 = dma.done.wait (%p471_p5), [#allocation5], 64  }
 0x1e2   : > { %540 = vsyncadd (%p471_p5), [#allocation5], 4294967232 }
 0x1e3   : > { %375 = sfence }
 0x1e4 PF: > { %s14_s14 = sadd.s32 1, %s551_s14   ;;  %s647_s12 = smov %s547_s13 }
 0x1e5   : > { %p11_p6 = scmp.ge.s32.totalorder %s14_s14, 5   ;;  %s648_s13 = smov %s650_s16 }
 0x1e7   :  { %13 = sbr.rel (!%p11_p6) target bundleno = 2 (0x2), region = 72 }
 0x1ec   :  { %381 = vsyncpa [#allocation5], 1 }
 0x1ed   :  { %383 = vsyncpa [#allocation5 + $0x1], 1 }

</bundles_post_ra>
